<compile_context>
chip_gen: v7x
topology: tpu7x:2x2x1
jax: 0.10.0
libtpu: 0.0.40
codegen_flags: <defaults>
</compile_context>

<pallas_src>
import functools

import jax
import jax.numpy as jnp
import numpy as np
from jax.experimental import pallas as pl
from jax.experimental.pallas import tpu as pltpu

_LN_EPS = 1e-5          # PyTorch nn.LayerNorm default
_NEG_SLOPE = 0.1        # nn.LeakyReLU(negative_slope=0.1) in the module


def _round_up(x, m):
    return ((x + m - 1) // m) * m


def _layer_norm_f32(v, gamma, beta):
    """LayerNorm over the last axis; v/gamma/beta already f32, gamma/beta (1, F)."""
    mu = jnp.mean(v, axis=-1, keepdims=True)
    var = jnp.mean((v - mu) * (v - mu), axis=-1, keepdims=True)
    # rsqrt lowers to the EUP slot (free vs a VPU divide).
    return (v - mu) * jax.lax.rsqrt(var + _LN_EPS) * gamma + beta


def _leaky_relu(v):
    return jnp.where(v > 0, v, _NEG_SLOPE * v)


def _residual_block_kernel(x_ref, g1_ref, be1_ref, w1_ref, b1_ref,
                           g2_ref, be2_ref, w2_ref, b2_ref, o_ref):
    # x tile loaded exactly once; reused for LN1 input AND the residual add.
    x = x_ref[...]
    xf = x.astype(jnp.float32)

    # LN1 -> LeakyReLU(0.1)   (all element-wise math in f32: v5e has no bf16 VPU/EUP)
    h = _leaky_relu(_layer_norm_f32(xf, g1_ref[...].astype(jnp.float32),
                                    be1_ref[...].astype(jnp.float32)))

    # Linear1: (TM, F_in) x (F_in, F_hid), single MXU call, f32 accumulation.
    h1 = jnp.dot(h.astype(w1_ref.dtype), w1_ref[...],
                 preferred_element_type=jnp.float32)
    h1 = h1 + b1_ref[...].astype(jnp.float32)

    # LN2 -> LeakyReLU(0.1)
    h2 = _leaky_relu(_layer_norm_f32(h1, g2_ref[...].astype(jnp.float32),
                                     be2_ref[...].astype(jnp.float32)))

    # Linear2: (TM, F_hid) x (F_hid, F_out), single MXU call, f32 accumulation.
    y = jnp.dot(h2.astype(w2_ref.dtype), w2_ref[...],
                preferred_element_type=jnp.float32)
    y = y + b2_ref[...].astype(jnp.float32)

    # Residual add (bypass = Identity since feat_in == feat_out), single fused store.
    o_ref[...] = (y + xf).astype(o_ref.dtype)


@functools.partial(jax.jit, static_argnames=("tm",))
def residual_block(x, gamma1, beta1, w1, b1, gamma2, beta2, w2, b2, *, tm=512):
    """Fused ResidualBlock forward.

    x:            (..., feat_in)
    w1:           (feat_in, feat_hidden)   == torch Linear1.weight.T
    b1:           (feat_hidden,)
    w2:           (feat_hidden, feat_out)  == torch Linear2.weight.T
    b2:           (feat_out,)
    gamma1/beta1: (feat_in,)   LN1 affine
    gamma2/beta2: (feat_hidden,) LN2 affine
    """
    feat_in = x.shape[-1]
    feat_hidden = w1.shape[1]
    feat_out = w2.shape[1]
    assert feat_in == feat_out, "bypass Linear path not implemented"
    # TODO(synk): add the nn.Linear bypass for feat_in != feat_out.

    orig_shape = x.shape
    x2 = x.reshape(-1, feat_in)
    m = x2.shape[0]

    # Row tile: multiple of 8, as large as the problem allows (sweep 256/512/1024
    # on big inputs; production F=128/256 keeps even TM=1024 far under VMEM limits).
    tm = min(tm, _round_up(m, 8))
    m_pad = _round_up(m, tm)
    if m_pad != m:
        x2 = jnp.pad(x2, ((0, m_pad - m), (0, 0)))

    # 1D params -> (1, F) so they live as lane-major 2D VMEM tiles.
    g1 = gamma1.reshape(1, feat_in)
    be1 = beta1.reshape(1, feat_in)
    b1r = b1.reshape(1, feat_hidden)
    g2 = gamma2.reshape(1, feat_hidden)
    be2 = beta2.reshape(1, feat_hidden)
    b2r = b2.reshape(1, feat_out)

    const = lambda i: (0, 0)  # resident-in-VMEM params: never re-DMA'd per tile

    out = pl.pallas_call(
        _residual_block_kernel,
        out_shape=jax.ShapeDtypeStruct((m_pad, feat_out), x.dtype),
        grid_spec=pltpu.PrefetchScalarGridSpec(
            num_scalar_prefetch=0,
            grid=(m_pad // tm,),
            in_specs=[
                pl.BlockSpec((tm, feat_in), lambda i: (i, 0)),        # x (tiled over rows)
                pl.BlockSpec((1, feat_in), const),                    # gamma1
                pl.BlockSpec((1, feat_in), const),                    # beta1
                pl.BlockSpec((feat_in, feat_hidden), const),          # W1 (resident)
                pl.BlockSpec((1, feat_hidden), const),                # b1
                pl.BlockSpec((1, feat_hidden), const),                # gamma2
                pl.BlockSpec((1, feat_hidden), const),                # beta2
                pl.BlockSpec((feat_hidden, feat_out), const),         # W2 (resident)
                pl.BlockSpec((1, feat_out), const),                   # b2
            ],
            out_specs=pl.BlockSpec((tm, feat_out), lambda i: (i, 0)),
        ),
        compiler_params=pltpu.CompilerParams(
            dimension_semantics=("parallel",),   # shard row tiles across TCs on v7x
        ),
    )(x2, g1, be1, w1, b1r, g2, be2, w2, b2r)

    return out[:m].reshape(orig_shape[:-1] + (feat_out,))


def residual_block_ref(x, gamma1, beta1, w1, b1, gamma2, beta2, w2, b2):
    """Pure-JAX reference matching the PyTorch module."""
    xf = x.astype(jnp.float32)

    def ln(v, g, b):
        mu = jnp.mean(v, axis=-1, keepdims=True)
        var = jnp.mean((v - mu) ** 2, axis=-1, keepdims=True)
        return (v - mu) * jax.lax.rsqrt(var + _LN_EPS) * g + b

    h = _leaky_relu(ln(xf, gamma1, beta1))
    h1 = h @ w1.astype(jnp.float32) + b1
    h2 = _leaky_relu(ln(h1, gamma2, beta2))
    y = h2 @ w2.astype(jnp.float32) + b2
    return (y + xf).astype(x.dtype)


if __name__ == "__main__":
    feat_in, feat_hidden, feat_out = 128, 256, 128
    batch, seq = 2, 8  # 16 rows total after flattening

    key = jax.random.PRNGKey(0)
    ks = jax.random.split(key, 8)
    x = jax.random.normal(ks[0], (batch, seq, feat_in), dtype=jnp.float32)

    # Parameters (JAX layout: W is (in, out) == torch weight.T).
    w1 = jax.random.normal(ks[1], (feat_in, feat_hidden), dtype=jnp.float32) * 0.05
    b1 = jax.random.normal(ks[2], (feat_hidden,), dtype=jnp.float32) * 0.05
    w2 = jax.random.normal(ks[3], (feat_hidden, feat_out), dtype=jnp.float32) * 0.05
    b2 = jax.random.normal(ks[4], (feat_out,), dtype=jnp.float32) * 0.05
    gamma1 = 1.0 + 0.05 * jax.random.normal(ks[5], (feat_in,), dtype=jnp.float32)
    beta1 = 0.05 * jax.random.normal(ks[6], (feat_in,), dtype=jnp.float32)
    gamma2 = 1.0 + 0.05 * jax.random.normal(ks[7], (feat_hidden,), dtype=jnp.float32)
    beta2 = jnp.zeros((feat_hidden,), dtype=jnp.float32)

    out = residual_block(x, gamma1, beta1, w1, b1, gamma2, beta2, w2, b2)
    out = jax.block_until_ready(out)

    ref = residual_block_ref(x, gamma1, beta1, w1, b1, gamma2, beta2, w2, b2)
    np.testing.assert_allclose(np.asarray(out), np.asarray(ref), rtol=2e-5, atol=2e-5)

    print("KERNEL_OK")
</pallas_src>

<mosaic_0001>
module attributes {stable_mosaic.version = 11 : i64} {
  func.func @_residual_block_kernel(%arg0: i32, %arg1: memref<16x128xf32, #tpu.memory_space<vmem>>, %arg2: memref<1x128xf32, #tpu.memory_space<vmem>>, %arg3: memref<1x128xf32, #tpu.memory_space<vmem>>, %arg4: memref<128x256xf32, #tpu.memory_space<vmem>>, %arg5: memref<1x256xf32, #tpu.memory_space<vmem>>, %arg6: memref<1x256xf32, #tpu.memory_space<vmem>>, %arg7: memref<1x256xf32, #tpu.memory_space<vmem>>, %arg8: memref<256x128xf32, #tpu.memory_space<vmem>>, %arg9: memref<1x128xf32, #tpu.memory_space<vmem>>, %arg10: memref<16x128xf32, #tpu.memory_space<vmem>>) attributes {dimension_semantics = [#tpu.dimension_semantics<parallel>], iteration_bounds = array<i64: 1>, scalar_prefetch = 0 : i64, scratch_operands = 0 : i64, tpu.core_type = #tpu.core_type<tc>, window_params = [{transform_indices = @transform_0, window_bounds = array<i64: 16, 128>}, {pipeline_mode = #tpu.pipeline_mode<synchronous>, transform_indices = @transform_1, window_bounds = array<i64: 1, 128>}, {pipeline_mode = #tpu.pipeline_mode<synchronous>, transform_indices = @transform_2, window_bounds = array<i64: 1, 128>}, {pipeline_mode = #tpu.pipeline_mode<synchronous>, transform_indices = @transform_3, window_bounds = array<i64: 128, 256>}, {pipeline_mode = #tpu.pipeline_mode<synchronous>, transform_indices = @transform_4, window_bounds = array<i64: 1, 256>}, {pipeline_mode = #tpu.pipeline_mode<synchronous>, transform_indices = @transform_5, window_bounds = array<i64: 1, 256>}, {pipeline_mode = #tpu.pipeline_mode<synchronous>, transform_indices = @transform_6, window_bounds = array<i64: 1, 256>}, {pipeline_mode = #tpu.pipeline_mode<synchronous>, transform_indices = @transform_7, window_bounds = array<i64: 256, 128>}, {pipeline_mode = #tpu.pipeline_mode<synchronous>, transform_indices = @transform_8, window_bounds = array<i64: 1, 128>}, {transform_indices = @transform_9, window_bounds = array<i64: 16, 128>}]} {
    %c0 = arith.constant 0 : index
    %c0_0 = arith.constant 0 : index
    %0 = vector.load %arg1[%c0, %c0_0] : memref<16x128xf32, #tpu.memory_space<vmem>>, vector<16x128xf32>
    %c0_1 = arith.constant 0 : index
    %c0_2 = arith.constant 0 : index
    %1 = vector.load %arg2[%c0_1, %c0_2] : memref<1x128xf32, #tpu.memory_space<vmem>>, vector<1x128xf32>
    %c0_3 = arith.constant 0 : index
    %c0_4 = arith.constant 0 : index
    %2 = vector.load %arg3[%c0_3, %c0_4] : memref<1x128xf32, #tpu.memory_space<vmem>>, vector<1x128xf32>
    %cst = arith.constant dense<0.000000e+00> : vector<16xf32>
    %3 = vector.multi_reduction <add>, %0, %cst [1] : vector<16x128xf32> to vector<16xf32>
    %4 = vector.shape_cast %3 : vector<16xf32> to vector<16x1xf32>
    %cst_5 = arith.constant 1.280000e+02 : f32
    %5 = vector.broadcast %cst_5 : f32 to vector<16x1xf32>
    %6 = arith.divf %4, %5 : vector<16x1xf32>
    %7 = vector.broadcast %6 : vector<16x1xf32> to vector<16x128xf32>
    %8 = arith.subf %0, %7 : vector<16x128xf32>
    %9 = vector.broadcast %6 : vector<16x1xf32> to vector<16x128xf32>
    %10 = arith.subf %0, %9 : vector<16x128xf32>
    %11 = arith.mulf %8, %10 : vector<16x128xf32>
    %cst_6 = arith.constant dense<0.000000e+00> : vector<16xf32>
    %12 = vector.multi_reduction <add>, %11, %cst_6 [1] : vector<16x128xf32> to vector<16xf32>
    %13 = vector.shape_cast %12 : vector<16xf32> to vector<16x1xf32>
    %cst_7 = arith.constant 1.280000e+02 : f32
    %14 = vector.broadcast %cst_7 : f32 to vector<16x1xf32>
    %15 = arith.divf %13, %14 : vector<16x1xf32>
    %16 = vector.broadcast %6 : vector<16x1xf32> to vector<16x128xf32>
    %17 = arith.subf %0, %16 : vector<16x128xf32>
    %cst_8 = arith.constant 9.99999974E-6 : f32
    %18 = vector.broadcast %cst_8 : f32 to vector<16x1xf32>
    %19 = arith.addf %15, %18 : vector<16x1xf32>
    %20 = math.rsqrt %19 : vector<16x1xf32>
    %21 = vector.broadcast %20 : vector<16x1xf32> to vector<16x128xf32>
    %22 = arith.mulf %17, %21 : vector<16x128xf32>
    %23 = vector.broadcast %1 : vector<1x128xf32> to vector<16x128xf32>
    %24 = arith.mulf %22, %23 : vector<16x128xf32>
    %25 = vector.broadcast %2 : vector<1x128xf32> to vector<16x128xf32>
    %26 = arith.addf %24, %25 : vector<16x128xf32>
    %cst_9 = arith.constant 0.000000e+00 : f32
    %27 = vector.broadcast %cst_9 : f32 to vector<16x128xf32>
    %28 = arith.cmpf ogt, %26, %27 : vector<16x128xf32>
    %cst_10 = arith.constant 1.000000e-01 : f32
    %29 = vector.broadcast %cst_10 : f32 to vector<16x128xf32>
    %30 = arith.mulf %29, %26 : vector<16x128xf32>
    %31 = arith.select %28, %26, %30 : vector<16x128xi1>, vector<16x128xf32>
    %c0_11 = arith.constant 0 : index
    %c0_12 = arith.constant 0 : index
    %32 = vector.load %arg4[%c0_11, %c0_12] : memref<128x256xf32, #tpu.memory_space<vmem>>, vector<128x256xf32>
    %cst_13 = arith.constant dense<0.000000e+00> : vector<16x256xf32>
    %33 = tpu.matmul %31, %32, %cst_13 {dimension_numbers = #tpu.dot_dimension_numbers<[1], [0], [0], [1], [0, 0, 1, 1], [], []>} : vector<16x128xf32>, vector<128x256xf32>, vector<16x256xf32> -> vector<16x256xf32>
    %c0_14 = arith.constant 0 : index
    %c0_15 = arith.constant 0 : index
    %34 = vector.load %arg5[%c0_14, %c0_15] : memref<1x256xf32, #tpu.memory_space<vmem>>, vector<1x256xf32>
    %35 = vector.broadcast %34 : vector<1x256xf32> to vector<16x256xf32>
    %36 = arith.addf %33, %35 : vector<16x256xf32>
    %c0_16 = arith.constant 0 : index
    %c0_17 = arith.constant 0 : index
    %37 = vector.load %arg6[%c0_16, %c0_17] : memref<1x256xf32, #tpu.memory_space<vmem>>, vector<1x256xf32>
    %c0_18 = arith.constant 0 : index
    %c0_19 = arith.constant 0 : index
    %38 = vector.load %arg7[%c0_18, %c0_19] : memref<1x256xf32, #tpu.memory_space<vmem>>, vector<1x256xf32>
    %cst_20 = arith.constant dense<0.000000e+00> : vector<16xf32>
    %39 = vector.multi_reduction <add>, %36, %cst_20 [1] : vector<16x256xf32> to vector<16xf32>
    %40 = vector.shape_cast %39 : vector<16xf32> to vector<16x1xf32>
    %cst_21 = arith.constant 2.560000e+02 : f32
    %41 = vector.broadcast %cst_21 : f32 to vector<16x1xf32>
    %42 = arith.divf %40, %41 : vector<16x1xf32>
    %43 = vector.broadcast %42 : vector<16x1xf32> to vector<16x256xf32>
    %44 = arith.subf %36, %43 : vector<16x256xf32>
    %45 = vector.broadcast %42 : vector<16x1xf32> to vector<16x256xf32>
    %46 = arith.subf %36, %45 : vector<16x256xf32>
    %47 = arith.mulf %44, %46 : vector<16x256xf32>
    %cst_22 = arith.constant dense<0.000000e+00> : vector<16xf32>
    %48 = vector.multi_reduction <add>, %47, %cst_22 [1] : vector<16x256xf32> to vector<16xf32>
    %49 = vector.shape_cast %48 : vector<16xf32> to vector<16x1xf32>
    %cst_23 = arith.constant 2.560000e+02 : f32
    %50 = vector.broadcast %cst_23 : f32 to vector<16x1xf32>
    %51 = arith.divf %49, %50 : vector<16x1xf32>
    %52 = vector.broadcast %42 : vector<16x1xf32> to vector<16x256xf32>
    %53 = arith.subf %36, %52 : vector<16x256xf32>
    %cst_24 = arith.constant 9.99999974E-6 : f32
    %54 = vector.broadcast %cst_24 : f32 to vector<16x1xf32>
    %55 = arith.addf %51, %54 : vector<16x1xf32>
    %56 = math.rsqrt %55 : vector<16x1xf32>
    %57 = vector.broadcast %56 : vector<16x1xf32> to vector<16x256xf32>
    %58 = arith.mulf %53, %57 : vector<16x256xf32>
    %59 = vector.broadcast %37 : vector<1x256xf32> to vector<16x256xf32>
    %60 = arith.mulf %58, %59 : vector<16x256xf32>
    %61 = vector.broadcast %38 : vector<1x256xf32> to vector<16x256xf32>
    %62 = arith.addf %60, %61 : vector<16x256xf32>
    %cst_25 = arith.constant 0.000000e+00 : f32
    %63 = vector.broadcast %cst_25 : f32 to vector<16x256xf32>
    %64 = arith.cmpf ogt, %62, %63 : vector<16x256xf32>
    %cst_26 = arith.constant 1.000000e-01 : f32
    %65 = vector.broadcast %cst_26 : f32 to vector<16x256xf32>
    %66 = arith.mulf %65, %62 : vector<16x256xf32>
    %67 = arith.select %64, %62, %66 : vector<16x256xi1>, vector<16x256xf32>
    %c0_27 = arith.constant 0 : index
    %c0_28 = arith.constant 0 : index
    %68 = vector.load %arg8[%c0_27, %c0_28] : memref<256x128xf32, #tpu.memory_space<vmem>>, vector<256x128xf32>
    %cst_29 = arith.constant dense<0.000000e+00> : vector<16x128xf32>
    %69 = tpu.matmul %67, %68, %cst_29 {dimension_numbers = #tpu.dot_dimension_numbers<[1], [0], [0], [1], [0, 0, 1, 1], [], []>} : vector<16x256xf32>, vector<256x128xf32>, vector<16x128xf32> -> vector<16x128xf32>
    %c0_30 = arith.constant 0 : index
    %c0_31 = arith.constant 0 : index
    %70 = vector.load %arg9[%c0_30, %c0_31] : memref<1x128xf32, #tpu.memory_space<vmem>>, vector<1x128xf32>
    %71 = vector.broadcast %70 : vector<1x128xf32> to vector<16x128xf32>
    %72 = arith.addf %69, %71 : vector<16x128xf32>
    %73 = arith.addf %72, %0 : vector<16x128xf32>
    %c0_32 = arith.constant 0 : index
    %c0_33 = arith.constant 0 : index
    %74 = vector.load %arg10[%c0_32, %c0_33] : memref<16x128xf32, #tpu.memory_space<vmem>>, vector<16x128xf32>
    tpu.vector_store %arg10[%c0_32, %c0_33], %73 {strides = array<i32>} : memref<16x128xf32, #tpu.memory_space<vmem>>, vector<16x128xf32>,
    return
  }
  func.func @transform_0(%arg0: i32) -> (i32, i32) {
    %c0_i32 = arith.constant 0 : i32
    %c0_i32_0 = arith.constant 0 : i32
    return %arg0, %c0_i32 : i32, i32
  }
  func.func @transform_1(%arg0: i32) -> (i32, i32) {
    %c0_i32 = arith.constant 0 : i32
    %c0_i32_0 = arith.constant 0 : i32
    %c0_i32_1 = arith.constant 0 : i32
    return %c0_i32, %c0_i32_0 : i32, i32
  }
  func.func @transform_2(%arg0: i32) -> (i32, i32) {
    %c0_i32 = arith.constant 0 : i32
    %c0_i32_0 = arith.constant 0 : i32
    %c0_i32_1 = arith.constant 0 : i32
    return %c0_i32, %c0_i32_0 : i32, i32
  }
  func.func @transform_3(%arg0: i32) -> (i32, i32) {
    %c0_i32 = arith.constant 0 : i32
    %c0_i32_0 = arith.constant 0 : i32
    %c0_i32_1 = arith.constant 0 : i32
    return %c0_i32, %c0_i32_0 : i32, i32
  }
  func.func @transform_4(%arg0: i32) -> (i32, i32) {
    %c0_i32 = arith.constant 0 : i32
    %c0_i32_0 = arith.constant 0 : i32
    %c0_i32_1 = arith.constant 0 : i32
    return %c0_i32, %c0_i32_0 : i32, i32
  }
  func.func @transform_5(%arg0: i32) -> (i32, i32) {
    %c0_i32 = arith.constant 0 : i32
    %c0_i32_0 = arith.constant 0 : i32
    %c0_i32_1 = arith.constant 0 : i32
    return %c0_i32, %c0_i32_0 : i32, i32
  }
  func.func @transform_6(%arg0: i32) -> (i32, i32) {
    %c0_i32 = arith.constant 0 : i32
    %c0_i32_0 = arith.constant 0 : i32
    %c0_i32_1 = arith.constant 0 : i32
    return %c0_i32, %c0_i32_0 : i32, i32
  }
  func.func @transform_7(%arg0: i32) -> (i32, i32) {
    %c0_i32 = arith.constant 0 : i32
    %c0_i32_0 = arith.constant 0 : i32
    %c0_i32_1 = arith.constant 0 : i32
    return %c0_i32, %c0_i32_0 : i32, i32
  }
  func.func @transform_8(%arg0: i32) -> (i32, i32) {
    %c0_i32 = arith.constant 0 : i32
    %c0_i32_0 = arith.constant 0 : i32
    %c0_i32_1 = arith.constant 0 : i32
    return %c0_i32, %c0_i32_0 : i32, i32
  }
  func.func @transform_9(%arg0: i32) -> (i32, i32) {
    %c0_i32 = arith.constant 0 : i32
    %c0_i32_0 = arith.constant 0 : i32
    return %arg0, %c0_i32 : i32, i32
  }
}

</mosaic_0001>

<bundles_post_ra>
// kernel: residual_block.1
= control target key start
LH: loop header
LB: loop body
LE: loop exit
PB: predicated region body
PF: predicated region fallthrough
CT: control target
= control target key end

     0   :  { %14 = vsyncpa [#allocation3], 0  ;;  %s811_s0 = inlined_call_operand.vmem [shape: f32[16,128], index: 0, kind: input, shape index: {}]   ;;  %s812_s1 = inlined_call_operand.vmem [shape: f32[1,128], index: 1, kind: input, shape index: {}]   ;;  %s813_s2 = inlined_call_operand.vmem [shape: f32[1,128], index: 2, kind: input, shape index: {}]   ;;  %s814_s3 = inlined_call_operand.hbm [shape: f32[128,256], index: 3, kind: input, shape index: {}]   ;;  %s815_s4 = inlined_call_operand.vmem [shape: f32[1,256], index: 4, kind: input, shape index: {}]   ;;  %s816_s5 = inlined_call_operand.vmem [shape: f32[1,256], index: 5, kind: input, shape index: {}]   ;;  %s817_s6 = inlined_call_operand.vmem [shape: f32[1,256], index: 6, kind: input, shape index: {}]   ;;  %s818_s7 = inlined_call_operand.hbm [shape: f32[256,128], index: 7, kind: input, shape index: {}]   ;;  %s819_s8 = inlined_call_operand.vmem [shape: f32[1,128], index: 8, kind: input, shape index: {}]   ;;  %s820_s9 = inlined_call_operand.hbm [shape: f32[16,128], index: 9, kind: output, shape index: {}]  }
   0x1   :  { %15 = vsyncpa [#allocation6], 0 }
   0x2   :  { %16 = vsyncpa [#allocation4], 0  ;;  %s637_s30 = smov [#allocation2]   ;;  %s565_s13 = scalar_lea.hbm %s814_s3, 4096 }
   0x3   :  { %s28_s10 = sshll.u32 %s637_s30, 4  ;;  %p566_p0 = scmp.ne.s32.totalorder %s814_s3, %s565_s13  ;;  %s29_s10 = int_to_ptr.vmem [resolvable:$true] %s28_s10 }
   0x4   :  { %p569_p1 = scmp.lt.u32.totalorder %s565_s13, %s814_s3 }
   0x6   :  { %p571_p2 = pnand %p569_p1, %p566_p0 }
   0x8   :  { %574 = shalt.err (!%p571_p2)
}
   0x9   :  { %s575_s18 = scalar_lea.vmem %s29_s10, 4096  ;;  %p580_p4 = scmp.lt.s32.totalorder %s29_s10, %s29_s10 }
   0xa   :  { %p576_p3 = scmp.ne.s32.totalorder %s29_s10, %s575_s18  ;;  %p581_p5 = scmp.lt.s32.totalorder %s575_s18, %s575_s18 }
   0xc   :  { %p582_p6 = por %p581_p5, %p580_p4 }
   0xe   :  { %p583_p7 = pnand %p582_p6, %p576_p3 }
  0x10   :  { %586 = shalt.err (!%p583_p7)
}
  0x11   :  { %s638_s19 = smov 256   ;;  %s639_s20 = smov 16  }
  0x12   :  { %34 = dma.hbm_to_vmem [thread:$0]  %s814_s3, 4096, %s29_s10, [#allocation3], %s638_s19, %s638_s19, %s639_s20  }
  0x13   :  { %s640_s23 = smov [#allocation5]   ;;  %s587_s27 = scalar_lea.hbm %s818_s7, 4096 }
  0x14   :  { %s46_s24 = sshll.u32 %s640_s23, 4  ;;  %p588_p8 = scmp.ne.s32.totalorder %s818_s7, %s587_s27  ;;  %s47_s24 = int_to_ptr.vmem [resolvable:$true] %s46_s24 }
  0x15   :  { %p591_p9 = scmp.lt.u32.totalorder %s587_s27, %s818_s7 }
  0x17   :  { %p593_p10 = pnand %p591_p9, %p588_p8 }
  0x19   :  { %596 = shalt.err (!%p593_p10)
}
  0x1a   :  { %s597_s12 = scalar_lea.vmem %s47_s24, 4096  ;;  %p602_p12 = scmp.lt.s32.totalorder %s47_s24, %s47_s24 }
  0x1b   :  { %p598_p11 = scmp.ne.s32.totalorder %s47_s24, %s597_s12  ;;  %p603_p13 = scmp.lt.s32.totalorder %s597_s12, %s597_s12 }
  0x1d   :  { %p604_p0 = por %p603_p13, %p602_p12 }
  0x1f   :  { %p605_p1 = pnand %p604_p0, %p598_p11 }
  0x21   :  { %608 = shalt.err (!%p605_p1)
}
  0x22   :  { %s641_s3 = smov 128   ;;  %s642_s10 = smov 8  }
  0x23   :  { %52 = dma.hbm_to_vmem [thread:$0]  %s818_s7, 4096, %s47_s24, [#allocation6], %s641_s3, %s641_s3, %s642_s10  }
  0x24   :  { %631 = dma.done.wait [#allocation3], 4096  }
  0x25   :  { %632 = vsyncadd [#allocation3], 4294963200 }
  0x26   :  { %633 = dma.done.wait [#allocation6], 4096  }
  0x27   :  { %634 = vsyncadd [#allocation6], 4294963200  ;;  %v725_v0 = vld [vmem:[%s811_s0] sm:$0xff]  ;;  %v731_v1 = vld [vmem:[%s811_s0 + $0x8] sm:$0xff]  ;;  %v643_v47 = vmov 0.0   ;;  %s644_s24 = smov [#allocation7]  }
  0x28   :  { %65 = vadd.xlane.f32.xlu0 %v725_v0  ;;  %v111_v2 = vld [vmem:[#allocation2 + $0x8] sm:$0xff]  ;;  %v113_v3 = vld [vmem:[#allocation2 + $0x18] sm:$0xff]  ;;  %v110_v4 = vld [vmem:[#allocation2] sm:$0xff]  ;;  %218 = vmatprep.mubr.f32.mxu0 %v643_v47  ;;  %s431_s25 = sshll.u32 %s644_s24, 4  ;;  %s432_s25 = int_to_ptr.vmem [resolvable:$true] %s431_s25 }
  0x29   :  { %v485_v5 = vpack.c.bf16 %v113_v3, %v111_v2  ;;  %v112_v6 = vld [vmem:[#allocation2 + $0x10] sm:$0xff]  ;;  %v115_v7 = vld [vmem:[#allocation2 + $0x28] sm:$0xff]  ;;  %v117_v8 = vld [vmem:[#allocation2 + $0x38] sm:$0xff]  ;;  %s609_s26 = scalar_lea.vmem %s432_s25, 256  ;;  %p614_p3 = scmp.lt.s32.totalorder %s432_s25, %s432_s25 }
  0x2a   :  { %v487_v9 = vpack.c.bf16 %v112_v6, %v110_v4  ;;  %v489_v10 = vpack.c.bf16 %v117_v8, %v115_v7  ;;  %v114_v11 = vld [vmem:[#allocation2 + $0x20] sm:$0xff]  ;;  %v116_v12 = vld [vmem:[#allocation2 + $0x30] sm:$0xff]  ;;  %v119_v22 = vld [vmem:[#allocation2 + $0x48] sm:$0xff]  ;;  %p610_p2 = scmp.ne.s32.totalorder %s432_s25, %s609_s26  ;;  %p615_p4 = scmp.lt.s32.totalorder %s609_s26, %s609_s26 }
  0x2b   :  { %486 = vmatprep.subr.bf16.mxu0 %v485_v5  ;;  %v491_v13 = vpack.c.bf16 %v116_v12, %v114_v11  ;;  %v121_v23 = vld [vmem:[#allocation2 + $0x58] sm:$0xff]  ;;  %v118_v25 = vld [vmem:[#allocation2 + $0x40] sm:$0xff]  ;;  %v120_v26 = vld [vmem:[#allocation2 + $0x50] sm:$0xff] }
  0x2c   :  { %67 = vadd.xlane.f32.xlu0 %v731_v1  ;;  %488 = vmatpush1.bf16.msra.mxu0 %v487_v9  ;;  %v493_v24 = vpack.c.bf16 %v121_v23, %v119_v22  ;;  %v495_v27 = vpack.c.bf16 %v120_v26, %v118_v25  ;;  %v123_v28 = vld [vmem:[#allocation2 + $0x68] sm:$0xff]  ;;  %v125_v29 = vld [vmem:[#allocation2 + $0x78] sm:$0xff]  ;;  %v122_v31 = vld [vmem:[#allocation2 + $0x60] sm:$0xff]  ;;  %p616_p5 = por %p615_p4, %p614_p3 }
  0x2d   :  { %490 = vmatprep.subr.bf16.mxu0 %v489_v10  ;;  %v497_v30 = vpack.c.bf16 %v125_v29, %v123_v28  ;;  %v124_v32 = vld [vmem:[#allocation2 + $0x70] sm:$0xff]  ;;  %v127_v34 = vld [vmem:[#allocation2 + $0x88] sm:$0xff]  ;;  %v129_v35 = vld [vmem:[#allocation2 + $0x98] sm:$0xff] }
  0x2e   :  { %v499_v33 = vpack.c.bf16 %v124_v32, %v122_v31  ;;  %v501_v36 = vpack.c.bf16 %v129_v35, %v127_v34  ;;  %v126_v37 = vld [vmem:[#allocation2 + $0x80] sm:$0xff]  ;;  %v128_v38 = vld [vmem:[#allocation2 + $0x90] sm:$0xff]  ;;  %v131_v40 = vld [vmem:[#allocation2 + $0xa8] sm:$0xff]  ;;  %p617_p6 = pnand %p616_p5, %p610_p2 }
  0x2f   :  { %v503_v39 = vpack.c.bf16 %v128_v38, %v126_v37  ;;  %v133_v41 = vld [vmem:[#allocation2 + $0xb8] sm:$0xff]  ;;  %v130_v42 = vld [vmem:[#allocation2 + $0xa0] sm:$0xff]  ;;  %v132_v44 = vld [vmem:[#allocation2 + $0xb0] sm:$0xff] }
  0x30   :  { %492 = vmatpush1.bf16.msra.mxu0 %v491_v13  ;;  %v505_v43 = vpack.c.bf16 %v133_v41, %v131_v40  ;;  %v135_v45 = vld [vmem:[#allocation2 + $0xc8] sm:$0xff]  ;;  %v137_v46 = vld [vmem:[#allocation2 + $0xd8] sm:$0xff]  ;;  %v507_v48 = vpack.c.bf16 %v132_v44, %v130_v42  ;;  %v134_v50 = vld [vmem:[#allocation2 + $0xc0] sm:$0xff] }
  0x31   :  { %494 = vmatprep.subr.bf16.mxu0 %v493_v24  ;;  %v509_v49 = vpack.c.bf16 %v137_v46, %v135_v45  ;;  %v136_v51 = vld [vmem:[#allocation2 + $0xd0] sm:$0xff]  ;;  %v139_v52 = vld [vmem:[#allocation2 + $0xe8] sm:$0xff]  ;;  %v141_v53 = vld [vmem:[#allocation2 + $0xf8] sm:$0xff] }
  0x32   :  { %v511_v54 = vpack.c.bf16 %v136_v51, %v134_v50  ;;  %v513_v55 = vpack.c.bf16 %v141_v53, %v139_v52  ;;  %v138_v56 = vld [vmem:[#allocation2 + $0xe0] sm:$0xff]  ;;  %v140_v57 = vld [vmem:[#allocation2 + $0xf0] sm:$0xff]  ;;  %v325_v35 = vld [vmem:[#allocation5 + $0x88] sm:$0xff] }
  0x33   :  { %v515_v58 = vpack.c.bf16 %v140_v57, %v138_v56  ;;  %v444_v4 = vld [vmem:[%s812_s1] ss:$0 sm:$0xff]  ;;  %v309_v38 = vld [vmem:[#allocation5 + $0x8] sm:$0xff]  ;;  %v327_v40 = vld [vmem:[#allocation5 + $0x98] sm:$0xff] }
  0x34   :  { %496 = vmatpush1.bf16.msra.mxu0 %v495_v27  ;;  %v445_v6 = vld [vmem:[%s813_s2] ss:$0 sm:$0xff]  ;;  %v311_v44 = vld [vmem:[#allocation5 + $0x18] sm:$0xff] }
  0x35   :  { %498 = vmatprep.subr.bf16.mxu0 %v497_v30  ;;  %v324_v34 = vld [vmem:[#allocation5 + $0x80] sm:$0xff] }
  0x36   :  { %v517_v37 = vpack.c.bf16 %v325_v35, %v324_v34  ;;  %v323_v34 = vld [vmem:[#allocation5 + $0x78] sm:$0xff] }
  0x38   :  { %500 = vmatpush1.bf16.msra.mxu0 %v499_v33  ;;  %518 = vmatprep.subr.bf16.mxu1 %v517_v37 }
  0x39   :  { %502 = vmatprep.subr.bf16.mxu0 %v501_v36  ;;  %v308_v36 = vld [vmem:[#allocation5] sm:$0xff] }
  0x3a   :  { %v519_v41 = vpack.c.bf16 %v309_v38, %v308_v36 }
  0x3c   :  { %504 = vmatpush1.bf16.msra.mxu0 %v503_v39  ;;  %v326_v39 = vld [vmem:[#allocation5 + $0x90] sm:$0xff]  ;;  %520 = vmatpush3.bf16.msra.mxu1 %v519_v41 }
  0x3d   :  { %506 = vmatprep.subr.bf16.mxu0 %v505_v43  ;;  %v521_v42 = vpack.c.bf16 %v327_v40, %v326_v39  ;;  %v310_v43 = vld [vmem:[#allocation5 + $0x10] sm:$0xff] }
  0x3e   :  { %v523_v45 = vpack.c.bf16 %v311_v44, %v310_v43  ;;  %v232_v43 = vld [vmem:[%s817_s6] sm:$0x3] }
  0x3f   :  { %522 = vmatprep.subr.bf16.mxu1 %v521_v42  ;;  %v231_v42 = vld [vmem:[%s816_s5] sm:$0x3] }
  0x40   :  { %508 = vmatpush1.bf16.msra.mxu0 %v507_v48  ;;  %524 = vmatpush3.bf16.msra.mxu1 %v523_v45 }
  0x41   :  { %510 = vmatprep.subr.bf16.mxu0 %v509_v49 }
  0x44   :  { %512 = vmatpush1.bf16.msra.mxu0 %v511_v54 }
  0x45   :  { %514 = vmatprep.subr.bf16.mxu0 %v513_v55 }
  0x48   :  { %516 = vmatpush1.bf16.msra.mxu0 %v515_v58 }
  0xb5   :  { %v66_v14 = vpop.xlane.xlu0 %65 }
  0xb6   :  { %v70_v15 = vmul.f32 0.0078125, %v66_v14 }
  0xb8   :  { %v735_v16 = vsub.f32 %v725_v0, %v70_v15 }
  0xb9   :  { %v68_v17 = vpop.xlane.xlu0 %67 }
  0xba   :  { %v71_v18 = vmul.f32 0.0078125, %v68_v17  ;;  %v74_v19 = vmul.f32 %v735_v16, %v735_v16 }
  0xbc   :  { %v740_v20 = vsub.f32 %v731_v1, %v71_v18  ;;  %76 = vadd.xlane.f32.xlu1 %v74_v19 }
  0xbe   :  { %v75_v21 = vmul.f32 %v740_v20, %v740_v20 }
  0xc0   :  { %78 = vadd.xlane.f32.xlu1 %v75_v21  ;;  %v142_v21 = vld [vmem:[%s815_s4] sm:$0x3] }
 0x149   :  { %v77_v59 = vpop.xlane.xlu1 %76 }
 0x14a   :  { %v80_v60 = vmul.f32 0.0078125, %v77_v59 }
 0x14c   :  { %v82_v61 = vadd.f32 1e-05, %v80_v60  ;;  %v328_v60 = vld [vmem:[#allocation5 + $0xa0] sm:$0xff] }
 0x14d   :  { %v79_v62 = vpop.xlane.xlu1 %78 }
 0x14e   :  { %557 = vrsqrt.f32 %v82_v61  ;;  %v81_v63 = vmul.f32 0.0078125, %v79_v62  ;;  %v329_v61 = vld [vmem:[#allocation5 + $0xa8] sm:$0xff] }
 0x14f   :  { %v525_v62 = vpack.c.bf16 %v329_v61, %v328_v60 }
 0x150   :  { %v83_v2 = vadd.f32 1e-05, %v81_v63  ;;  %v312_v63 = vld [vmem:[#allocation5 + $0x20] sm:$0xff] }
 0x151   :  { %526 = vmatprep.subr.bf16.mxu1 %v525_v62 }
 0x152   :  { %559 = vrsqrt.f32 %v83_v2  ;;  %v313_v2 = vld [vmem:[#allocation5 + $0x28] sm:$0xff] }
 0x158   :  { %v558_v3 = vpop.eup %557 }
 0x159   :  { %v86_v5 = vmul.f32 %v558_v3, %v735_v16  ;;  %v144_v16 = vlaneseq  ;;  %v527_v3 = vpack.c.bf16 %v313_v2, %v312_v63 }
 0x15b   :  { %v94_v7 = vmul.f32 %v444_v4, %v86_v5  ;;  %v145_v18 = vshrl.u32 %v144_v16, 7  ;;  %528 = vmatpush3.bf16.msra.mxu1 %v527_v3  ;;  %v331_v5 = vld [vmem:[#allocation5 + $0xb8] sm:$0xff] }
 0x15c   :  { %v560_v8 = vpop.eup %559  ;;  %v335_v16 = vld [vmem:[#allocation5 + $0xd8] sm:$0xff] }
 0x15d   :  { %v102_v9 = vadd.f32 %v445_v6, %v94_v7  ;;  %v87_v10 = vmul.f32 %v560_v8, %v740_v20  ;;  %v752_v19 = vsub.s32 0, %v145_v18  ;;  %v757_v20 = vsub.s32 1, %v145_v18  ;;  %v314_v7 = vld [vmem:[#allocation5 + $0x30] sm:$0xff]  ;;  %v315_v8 = vld [vmem:[#allocation5 + $0x38] sm:$0xff] }
 0x15e   :  { %v318_v18 = vld [vmem:[#allocation5 + $0x50] sm:$0xff] }
 0x15f   :  { %vm104_vm0 = vcmp.gt.f32.partialorder %v102_v9, 0.0  ;;  %v106_v11 = vmul.f32 0.1, %v102_v9  ;;  %v95_v12 = vmul.f32 %v444_v4, %v87_v10  ;;  %v147_v22 = vrot.slane %v142_v21, %v752_v19  ;;  %v330_v4 = vld [vmem:[#allocation5 + $0xb0] sm:$0xff]  ;;  %v332_v10 = vld [vmem:[#allocation5 + $0xc0] sm:$0xff] }
 0x160   :  { %v151_v23 = vrot.slane %v142_v21, %v757_v20  ;;  %v274_v44 = vrot.slane %v231_v42, %v757_v20  ;;  %v270_v45 = vrot.slane %v231_v42, %v752_v19 }
 0x161   :  { %v108_v13 = vsel %vm104_vm0, %v102_v9, %v106_v11  ;;  %v103_v14 = vadd.f32 %v445_v6, %v95_v12  ;;  %v529_v6 = vpack.c.bf16 %v331_v5, %v330_v4  ;;  %v531_v9 = vpack.c.bf16 %v315_v8, %v314_v7  ;;  %v333_v11 = vld [vmem:[#allocation5 + $0xc8] sm:$0xff]  ;;  %v446_v7 = vld [vmem:[%s819_s8] ss:$0 sm:$0xff] }
 0x162   :  { %219 = vmatmul.mubr.f32.vlgmr.msra.gmra.mrb[0].mxu0 %v108_v13  ;;  %v533_v12 = vpack.c.bf16 %v333_v11, %v332_v10  ;;  %v316_v13 = vld [vmem:[#allocation5 + $0x40] sm:$0xff] }
 0x163   :  { %224 = vmatprep.mubr.f32.mxu0 %v643_v47  ;;  %vm105_vm1 = vcmp.gt.f32.partialorder %v103_v14, 0.0  ;;  %v107_v15 = vmul.f32 0.1, %v103_v14  ;;  %530 = vmatprep.subr.bf16.mxu1 %v529_v6 }
 0x164   :  { %532 = vmatpush3.bf16.msra.mxu1 %v531_v9 }
 0x165   :  { %v109_v17 = vsel %vm105_vm1, %v103_v14, %v107_v15  ;;  %v317_v14 = vld [vmem:[#allocation5 + $0x48] sm:$0xff]  ;;  %534 = vmatprep.subr.bf16.mxu1 %v533_v12 }
 0x166   :  { %225 = vmatmul.mubr.f32.gmra.mrb[2].mxu0 %v109_v17  ;;  %v535_v15 = vpack.c.bf16 %v317_v14, %v316_v13  ;;  %v334_v17 = vld [vmem:[#allocation5 + $0xd0] sm:$0xff] }
 0x167   :  { %v537_v21 = vpack.c.bf16 %v335_v16, %v334_v17 }
 0x168   :  { %536 = vmatpush3.bf16.msra.mxu1 %v535_v15 }
 0x169   :  { %538 = vmatprep.subr.bf16.mxu1 %v537_v21 }
 0x235   :  { %v220_v24 = vpop.f32.mrb[0].mxu0 }
 0x236   :  { %v221_v25 = vadd.f32 %v220_v24, %v147_v22  ;;  %v222_v26 = vpop.f32.mrb[1].mxu0  ;;  %v337_v24 = vld [vmem:[#allocation5 + $0xe8] sm:$0xff] }
 0x237   :  { %v223_v27 = vadd.f32 %v222_v26, %v151_v23 }
 0x239   :  { %v226_v28 = vpop.f32.mrb[2].mxu0  ;;  %v233_v29 = vadd.f32 %v223_v27, %v221_v25 }
 0x23a   :  { %v227_v30 = vadd.f32 %v226_v28, %v147_v22  ;;  %v228_v31 = vpop.f32.mrb[3].mxu0  ;;  %v319_v22 = vld [vmem:[#allocation5 + $0x58] sm:$0xff]  ;;  %v321_v28 = vld [vmem:[#allocation5 + $0x68] sm:$0xff] }
 0x23b   :  { %v229_v32 = vadd.f32 %v228_v31, %v151_v23  ;;  %234 = vadd.xlane.f32.xlu0 %v233_v29  ;;  %v336_v23 = vld [vmem:[#allocation5 + $0xe0] sm:$0xff]  ;;  %v338_v29 = vld [vmem:[#allocation5 + $0xf0] sm:$0xff] }
 0x23c   :  { %v541_v26 = vpack.c.bf16 %v337_v24, %v336_v23 }
 0x23d   :  { %v236_v33 = vadd.f32 %v229_v32, %v227_v30 }
 0x23f   :  { %237 = vadd.xlane.f32.xlu1 %v236_v33  ;;  %v322_v33 = vld [vmem:[#allocation5 + $0x70] sm:$0xff] }
 0x240   :  { %v547_v35 = vpack.c.bf16 %v323_v34, %v322_v33 }
 0x2c8   :  { %v235_v46 = vpop.xlane.xlu0 %234 }
 0x2c9   :  { %v240_v47 = vmul.f32 0.00390625, %v235_v46 }
 0x2cb   :  { %v761_v48 = vsub.f32 %v221_v25, %v240_v47  ;;  %v763_v49 = vsub.f32 %v223_v27, %v240_v47  ;;  %v539_v25 = vpack.c.bf16 %v319_v22, %v318_v18  ;;  %v320_v27 = vld [vmem:[#allocation5 + $0x60] sm:$0xff] }
 0x2cc   :  { %v238_v50 = vpop.xlane.xlu1 %237  ;;  %v543_v31 = vpack.c.bf16 %v321_v28, %v320_v27 }
 0x2cd   :  { %v241_v51 = vmul.f32 0.00390625, %v238_v50  ;;  %v246_v52 = vmul.f32 %v761_v48, %v761_v48  ;;  %v247_v53 = vmul.f32 %v763_v49, %v763_v49  ;;  %540 = vmatpush3.bf16.msra.mxu1 %v539_v25  ;;  %v289_v50 = vrot.slane %v232_v43, %v757_v20 }
 0x2ce   :  { %542 = vmatprep.subr.bf16.mxu1 %v541_v26 }
 0x2cf   :  { %v769_v54 = vsub.f32 %v227_v30, %v241_v51  ;;  %v771_v55 = vsub.f32 %v229_v32, %v241_v51  ;;  %v250_v56 = vadd.f32 %v247_v53, %v246_v52  ;;  %v339_v30 = vld [vmem:[#allocation5 + $0xf8] sm:$0xff]  ;;  %v285_v52 = vrot.slane %v232_v43, %v752_v19 }
 0x2d0   :  { %v545_v32 = vpack.c.bf16 %v339_v30, %v338_v29 }
 0x2d1   :  { %251 = vadd.xlane.f32.xlu0 %v250_v56  ;;  %v248_v57 = vmul.f32 %v769_v54, %v769_v54  ;;  %v249_v58 = vmul.f32 %v771_v55, %v771_v55  ;;  %544 = vmatpush3.bf16.msra.mxu1 %v543_v31 }
 0x2d2   :  { %546 = vmatprep.subr.bf16.mxu1 %v545_v32 }
 0x2d3   :  { %v253_v59 = vadd.f32 %v249_v58, %v248_v57 }
 0x2d5   :  { %254 = vadd.xlane.f32.xlu1 %v253_v59  ;;  %548 = vmatpush3.bf16.msra.mxu1 %v547_v35 }
 0x35e   :  { %v252_v36 = vpop.xlane.xlu0 %251 }
 0x35f   :  { %v256_v37 = vmul.f32 0.00390625, %v252_v36 }
 0x361   :  { %v258_v38 = vadd.f32 1e-05, %v256_v37 }
 0x362   :  { %v255_v39 = vpop.xlane.xlu1 %254 }
 0x363   :  { %561 = vrsqrt.f32 %v258_v38  ;;  %v257_v40 = vmul.f32 0.00390625, %v255_v39 }
 0x365   :  { %v259_v41 = vadd.f32 1e-05, %v257_v40 }
 0x367   :  { %563 = vrsqrt.f32 %v259_v41 }
 0x36d   :  { %v562_v46 = vpop.eup %561 }
 0x36e   :  { %v263_v47 = vmul.f32 %v562_v46, %v763_v49  ;;  %v262_v51 = vmul.f32 %v562_v46, %v761_v48 }
 0x370   :  { %v278_v53 = vmul.f32 %v274_v44, %v263_v47  ;;  %v277_v56 = vmul.f32 %v270_v45, %v262_v51 }
 0x371   :  { %v564_v57 = vpop.eup %563 }
 0x372   :  { %v293_v58 = vadd.f32 %v289_v50, %v278_v53  ;;  %v292_v59 = vadd.f32 %v285_v52, %v277_v56  ;;  %v265_v60 = vmul.f32 %v564_v57, %v771_v55  ;;  %v264_v61 = vmul.f32 %v564_v57, %v769_v54 }
 0x374   :  { %vm297_vm2 = vcmp.gt.f32.partialorder %v293_v58, 0.0  ;;  %v301_v62 = vmul.f32 0.1, %v293_v58  ;;  %vm296_vm3 = vcmp.gt.f32.partialorder %v292_v59, 0.0  ;;  %v300_v63 = vmul.f32 0.1, %v292_v59 }
 0x375   :  { %v280_v49 = vmul.f32 %v274_v44, %v265_v60  ;;  %v279_v2 = vmul.f32 %v270_v45, %v264_v61 }
 0x376   :  { %v305_v20 = vsel %vm297_vm2, %v293_v58, %v301_v62  ;;  %v304_v3 = vsel %vm296_vm3, %v292_v59, %v300_v63 }
 0x377   :  { %411 = vmatprep.mubr.f32.mxu1 %v305_v20  ;;  %v295_v48 = vadd.f32 %v289_v50, %v280_v49  ;;  %v294_v19 = vadd.f32 %v285_v52, %v279_v2 }
 0x378   :  { %412 = vmatmul.mubr.f32.vlgmr.msra.gmra.mrb[0].mxu1 %v304_v3 }
 0x379   :  { %vm299_vm4 = vcmp.gt.f32.partialorder %v295_v48, 0.0  ;;  %v303_v4 = vmul.f32 0.1, %v295_v48  ;;  %vm298_vm5 = vcmp.gt.f32.partialorder %v294_v19, 0.0  ;;  %v302_v5 = vmul.f32 0.1, %v294_v19 }
 0x37b   :  { %v307_v6 = vsel %vm299_vm4, %v295_v48, %v303_v4  ;;  %v306_v55 = vsel %vm298_vm5, %v294_v19, %v302_v5 }
 0x37c   :  { %416 = vmatprep.mubr.f32.mxu1 %v307_v6 }
 0x37d   :  { %417 = vmatmul.mubr.f32.gmra.mrb[2].mxu1 %v306_v55 }
 0x44b   :  { %v479_v54 = vpop.f32.mrb[0].mxu1 }
 0x44c   :  { %v480_v8 = vpop.f32.mrb[1].mxu1 }
 0x44d   :  { %v481_v9 = vadd.f32 %v480_v8, %v479_v54 }
 0x44f   :  { %v414_v10 = vadd.f32 %v481_v9, %v446_v7 }
 0x450   :  { %v482_v11 = vpop.f32.mrb[2].mxu1 }
 0x451   :  { %v422_v12 = vadd.f32 %v414_v10, %v725_v0  ;;  %v483_v13 = vpop.f32.mrb[3].mxu1 }
 0x452   :  { %v484_v14 = vadd.f32 %v483_v13, %v482_v11 }
 0x453   :  { %424 = vst [vmem:[#allocation7] sm:$0xff] %v422_v12 }
 0x454   :  { %v419_v15 = vadd.f32 %v484_v14, %v446_v7 }
 0x456   :  { %v423_v17 = vadd.f32 %v419_v15, %v731_v1 }
 0x458   :  { %425 = vst [vmem:[#allocation7 + $0x8] sm:$0xff] %v423_v17 }
 0x459   :  { %620 = shalt.err (!%p617_p6)
}
 0x45a   :  { %s621_s28 = scalar_lea.hbm %s820_s9, 256 }
 0x45b   :  { %p622_p7 = scmp.ne.s32.totalorder %s820_s9, %s621_s28  ;;  %p625_p8 = scmp.lt.u32.totalorder %s621_s28, %s820_s9 }
 0x45d   :  { %p627_p9 = pnand %p625_p8, %p622_p7 }
 0x45f   :  { %630 = shalt.err (!%p627_p9)
}
 0x460   :  { %437 = dma.vmem_to_hbm [thread:$0]  %s432_s25, 256, %s820_s9, [#allocation4], %s641_s3, %s641_s3, %s642_s10  }
 0x461   :  { %635 = dma.done.wait [#allocation4], 256  }
 0x462   :  { %636 = vsyncadd [#allocation4], 4294967040 }
 0x463   :  { %441 = vsyncpa [#allocation3], 1 }
 0x464   :  { %442 = vsyncpa [#allocation6], 1 }
 0x465   :  { %443 = vsyncpa [#allocation4], 1 }

</bundles_post_ra>
